<compile_context>
chip_gen: v7x
topology: tpu7x:2x2x1
jax: 0.10.0
libtpu: 0.0.40
codegen_flags: <defaults>
</compile_context>

<pallas_src>
import numpy as np
import jax
import jax.numpy as jnp
from jax import lax
from jax.experimental import pallas as pl
from jax.experimental.pallas import tpu as pltpu


_PARALLEL_1D = pltpu.CompilerParams(dimension_semantics=("parallel",))


# ----------------------------------------------------------------------------
# Pallas kernels
# ----------------------------------------------------------------------------
def _matmul_kernel(x_ref, w_ref, o_ref):
    o_ref[...] = jnp.dot(
        x_ref[...], w_ref[...], preferred_element_type=jnp.float32
    ).astype(o_ref.dtype)


def _matmul_bias_kernel(x_ref, w_ref, b_ref, o_ref):
    acc = jnp.dot(x_ref[...], w_ref[...], preferred_element_type=jnp.float32)
    o_ref[...] = (acc + b_ref[...]).astype(o_ref.dtype)


def _swiglu_kernel(x_ref, wg_ref, bg_ref, wl_ref, bl_ref, beta_ref, o_ref):
    # Fused: g = x@Wg + bg ; l = x@Wl + bl ; out = g * sigmoid(beta * g) * l
    x = x_ref[...]
    g = jnp.dot(x, wg_ref[...], preferred_element_type=jnp.float32) + bg_ref[...]
    l = jnp.dot(x, wl_ref[...], preferred_element_type=jnp.float32) + bl_ref[...]
    beta = beta_ref[0]
    o_ref[...] = (g * jax.nn.sigmoid(beta * g) * l).astype(o_ref.dtype)


def _rmsnorm_kernel(x_ref, scale_ref, o_ref):
    # Reference RMSNorm: per-batch Frobenius norm over the whole (seq, d) slab.
    x = x_ref[0]                                        # (m, d)
    n_el = x.shape[0] * x.shape[1]
    ff_rms = jnp.sqrt(jnp.sum(x * x)) * (float(n_el) ** -0.5)
    o_ref[0] = (scale_ref[...] * (x / ff_rms)).astype(o_ref.dtype)


def _mha_rope_kernel(cos_ref, sin_ref, qe_ref, qo_ref, ke_ref, ko_ref, v_ref, o_ref):
    # One (batch, head) per grid step.  q/k arrive already split into their
    # even/odd channel halves (the split is absorbed into the fused QKV weight
    # layout), so RoPE is purely elementwise:
    #   rot_e = e*cos + o*sin ; rot_o = o*cos - e*sin
    # and the rotated score is  rot_e(q)@rot_e(k)^T + rot_o(q)@rot_o(k)^T.
    cos = cos_ref[...]                                  # (m, d/2)
    sin = sin_ref[...]
    qe, qo = qe_ref[0], qo_ref[0]                       # (m, d/2)
    ke, ko = ke_ref[0], ko_ref[0]
    v = v_ref[0]                                        # (m, d)
    m, d = v.shape

    qre = qe * cos + qo * sin
    qro = qo * cos - qe * sin
    kre = ke * cos + ko * sin
    kro = ko * cos - ke * sin

    dims = (((1,), (1,)), ((), ()))                     # contract feature dim
    s = lax.dot_general(qre, kre, dims, preferred_element_type=jnp.float32)
    s = s + lax.dot_general(qro, kro, dims, preferred_element_type=jnp.float32)
    s = s * (float(d) ** -0.5)

    row = lax.broadcasted_iota(jnp.int32, (m, m), 0)
    col = lax.broadcasted_iota(jnp.int32, (m, m), 1)
    s = jnp.where(col <= row, s, jnp.float32(-1e30))    # causal mask
    s = s - jnp.max(s, axis=-1, keepdims=True)
    p = jnp.exp(s)
    p = p / jnp.sum(p, axis=-1, keepdims=True)
    # TODO(synk): SDPA dropout_p=0.1 omitted (eval semantics).
    o_ref[0] = jnp.dot(p, v, preferred_element_type=jnp.float32).astype(o_ref.dtype)


# ----------------------------------------------------------------------------
# Pallas-call wrappers
# ----------------------------------------------------------------------------
def _pick_row_tile(M):
    """Largest row tile <= 256 that evenly divides M (256-multiples feed the
    2x256 MXU on v6e/v7x); tiny M uses a single full block."""
    if M <= 256:
        return M
    for t in (256, 128, 64, 32, 16, 8):
        if M % t == 0:
            return t
    return M


def linear2d(x2d, w, b=None):
    M, K = x2d.shape
    N = w.shape[1]
    tm = _pick_row_tile(M)
    if b is None:
        return pl.pallas_call(
            _matmul_kernel,
            out_shape=jax.ShapeDtypeStruct((M, N), x2d.dtype),
            grid=(M // tm,),
            in_specs=[
                pl.BlockSpec((tm, K), lambda i: (i, 0)),
                pl.BlockSpec((K, N), lambda i: (0, 0)),
            ],
            out_specs=pl.BlockSpec((tm, N), lambda i: (i, 0)),
            compiler_params=_PARALLEL_1D,
        )(x2d, w)
    return pl.pallas_call(
        _matmul_bias_kernel,
        out_shape=jax.ShapeDtypeStruct((M, N), x2d.dtype),
        grid=(M // tm,),
        in_specs=[
            pl.BlockSpec((tm, K), lambda i: (i, 0)),
            pl.BlockSpec((K, N), lambda i: (0, 0)),
            pl.BlockSpec((1, N), lambda i: (0, 0)),
        ],
        out_specs=pl.BlockSpec((tm, N), lambda i: (i, 0)),
        compiler_params=_PARALLEL_1D,
    )(x2d, w, b.reshape(1, N))


def linear3d(x, w, b=None):
    bsz, m, k = x.shape
    return linear2d(x.reshape(bsz * m, k), w, b).reshape(bsz, m, w.shape[1])


def swiglu2d(x2d, sp):
    M, K = x2d.shape
    tm = _pick_row_tile(M)
    return pl.pallas_call(
        _swiglu_kernel,
        out_shape=jax.ShapeDtypeStruct((M, K), x2d.dtype),
        grid=(M // tm,),
        in_specs=[
            pl.BlockSpec((tm, K), lambda i: (i, 0)),
            pl.BlockSpec((K, K), lambda i: (0, 0)),
            pl.BlockSpec((1, K), lambda i: (0, 0)),
            pl.BlockSpec((K, K), lambda i: (0, 0)),
            pl.BlockSpec((1, K), lambda i: (0, 0)),
            pl.BlockSpec(memory_space=pltpu.MemorySpace.SMEM),   # beta scalar
        ],
        out_specs=pl.BlockSpec((tm, K), lambda i: (i, 0)),
        compiler_params=_PARALLEL_1D,
    )(x2d, sp["wg"], sp["bg"].reshape(1, K), sp["wl"], sp["bl"].reshape(1, K),
      sp["beta"])


def swiglu3d(x, sp):
    b, m, d = x.shape
    return swiglu2d(x.reshape(b * m, d), sp).reshape(b, m, d)


def rmsnorm(x, scale):
    b, m, d = x.shape
    scale_m = scale[:m, :]
    return pl.pallas_call(
        _rmsnorm_kernel,
        out_shape=jax.ShapeDtypeStruct((b, m, d), x.dtype),
        grid=(b,),
        in_specs=[
            pl.BlockSpec((1, m, d), lambda i: (i, 0, 0)),
            pl.BlockSpec((m, d), lambda i: (0, 0)),
        ],
        out_specs=pl.BlockSpec((1, m, d), lambda i: (i, 0, 0)),
        compiler_params=_PARALLEL_1D,
    )(x, scale_m)


def mha_rope_attention(qe, qo, ke, ko, v, cos, sin):
    # qe/qo/ke/ko: (b*H, m, d/2) ; v: (b*H, m, d) ; cos/sin: (m, d/2)
    BH, m, d = v.shape
    hh = qe.shape[-1]
    return pl.pallas_call(
        _mha_rope_kernel,
        out_shape=jax.ShapeDtypeStruct((BH, m, d), v.dtype),
        grid=(BH,),
        in_specs=[
            pl.BlockSpec((m, hh), lambda i: (0, 0)),
            pl.BlockSpec((m, hh), lambda i: (0, 0)),
            pl.BlockSpec((1, m, hh), lambda i: (i, 0, 0)),
            pl.BlockSpec((1, m, hh), lambda i: (i, 0, 0)),
            pl.BlockSpec((1, m, hh), lambda i: (i, 0, 0)),
            pl.BlockSpec((1, m, hh), lambda i: (i, 0, 0)),
            pl.BlockSpec((1, m, d), lambda i: (i, 0, 0)),
        ],
        out_specs=pl.BlockSpec((1, m, d), lambda i: (i, 0, 0)),
        compiler_params=_PARALLEL_1D,
    )(cos, sin, qe, qo, ke, ko, v)


# ----------------------------------------------------------------------------
# Model glue
# ----------------------------------------------------------------------------
def multihead_attention(x, ap, cos, sin):
    b, m, d = x.shape
    hh = d // 2
    wqkv = ap["wqkv"]                                   # (d, 3*H*d)
    H = wqkv.shape[1] // (3 * d)
    qkv = linear3d(x, wqkv)                             # one fused bias-free matmul
    splits = [H * hh, 2 * H * hh, 3 * H * hh, 4 * H * hh]
    qe, qo, ke, ko, v = jnp.split(qkv, splits, axis=-1)

    def to_heads(t, w):
        return t.reshape(b, m, H, w).transpose(0, 2, 1, 3).reshape(b * H, m, w)

    heads = mha_rope_attention(to_heads(qe, hh), to_heads(qo, hh),
                               to_heads(ke, hh), to_heads(ko, hh),
                               to_heads(v, d), cos, sin)        # (b*H, m, d)
    # Re-assemble torch.cat(heads, dim=-1) layout (tiny XLA transpose).
    cat = heads.reshape(b, H, m, d).transpose(0, 2, 1, 3).reshape(b, m, H * d)
    out = linear3d(cat, ap["wo"], ap["bo"])             # head-merge linear
    # TODO(synk): nn.Dropout(0.1) after the merge linear omitted (eval).
    return out


def llama_block(x, bp, cos, sin):
    x = rmsnorm(x, bp["rms_scale"])
    x = x + multihead_attention(x, bp["attn"], cos, sin)
    x = rmsnorm(x, bp["rms_scale"])
    ff = linear3d(x, bp["ff_w"], bp["ff_b"])
    ff = swiglu3d(ff, bp["swiglu"])
    x = x + ff
    return x


def llama_forward(params, idx):
    # TODO(synk): embedding gather in plain JAX (data-dependent gather).
    x = jnp.take(params["emb"], idx, axis=0)            # (b, m, d)
    m = idx.shape[1]
    cos = params["rope_cos"][:m]
    sin = params["rope_sin"][:m]
    for bp in params["blocks"]:
        x = llama_block(x, bp, cos, sin)
    h = linear3d(x, params["ffn_w1"], params["ffn_b1"])
    h = swiglu3d(h, params["ffn_swiglu"])
    return linear3d(h, params["ffn_w2"], params["ffn_b2"])


# ----------------------------------------------------------------------------
# Deterministic parameter init (mirrors the PyTorch module structure)
# ----------------------------------------------------------------------------
def get_rope_tables(context_window, embedding_dim):
    # cos/sin of the reference's rotary angles (the (i-1) quirk is preserved).
    half = embedding_dim // 2
    pos = np.arange(context_window, dtype=np.float64)[:, None]
    i = np.arange(half, dtype=np.float64)[None, :]
    theta = 10000.0 ** (-2.0 * (i - 1.0) / embedding_dim)
    ang = pos * theta
    return (jnp.asarray(np.cos(ang), jnp.float32),
            jnp.asarray(np.sin(ang), jnp.float32))


def _dense(key, shape, scale=0.02):
    return (scale * jax.random.normal(key, shape)).astype(jnp.float32)


def init_swiglu(key, size):
    k = jax.random.split(key, 4)
    return {
        "wg": _dense(k[0], (size, size)),
        "bg": _dense(k[1], (size,)),
        "wl": _dense(k[2], (size, size)),
        "bl": _dense(k[3], (size,)),
        "beta": jnp.ones((1,), jnp.float32),
    }


def init_llama_params(key, cfg):
    d, cw, H, L, V = (cfg["d_model"], cfg["context_window"], cfg["n_heads"],
                      cfg["n_layers"], cfg["vocab_size"])
    even = np.arange(0, d, 2)
    odd = np.arange(1, d, 2)
    cos, sin = get_rope_tables(cw, d)
    keys = jax.random.split(key, 2 + L)
    params = {
        "emb": _dense(keys[0], (V, d), scale=1.0),
        "rope_cos": cos,
        "rope_sin": sin,
        "blocks": [],
    }
    for li in range(L):
        bk = jax.random.split(keys[1 + li], 3 + 3 * H)
        qe_cols, qo_cols, ke_cols, ko_cols, v_cols = [], [], [], [], []
        for h in range(H):
            wq = _dense(bk[3 * h + 0], (d, d))   # stored as (in, out): y = x @ W
            wk = _dense(bk[3 * h + 1], (d, d))
            wv = _dense(bk[3 * h + 2], (d, d))
            # de-interleave q/k output channels so RoPE is elementwise on halves
            qe_cols.append(wq[:, even]); qo_cols.append(wq[:, odd])
            ke_cols.append(wk[:, even]); ko_cols.append(wk[:, odd])
            v_cols.append(wv)
        wqkv = jnp.concatenate(qe_cols + qo_cols + ke_cols + ko_cols + v_cols,
                               axis=1)                           # (d, 3*H*d)
        params["blocks"].append({
            "rms_scale": jnp.ones((cw, d), jnp.float32),
            "attn": {
                "wqkv": wqkv,
                "wo": _dense(bk[3 * H + 0], (H * d, d)),
                "bo": jnp.zeros((d,), jnp.float32),
            },
            "ff_w": _dense(bk[3 * H + 1], (d, d)),
            "ff_b": jnp.zeros((d,), jnp.float32),
            "swiglu": init_swiglu(bk[3 * H + 2], d),
        })
    fk = jax.random.split(keys[1 + L], 3)
    params["ffn_w1"] = _dense(fk[0], (d, d))
    params["ffn_b1"] = jnp.zeros((d,), jnp.float32)
    params["ffn_swiglu"] = init_swiglu(fk[1], d)
    params["ffn_w2"] = _dense(fk[2], (d, V))
    params["ffn_b2"] = jnp.zeros((V,), jnp.float32)
    return params


# ----------------------------------------------------------------------------
if __name__ == "__main__":
    cfg = {
        "vocab_size": 64,
        "d_model": 32,
        "context_window": 8,
        "n_heads": 2,
        "n_layers": 2,
    }
    batch, seq = 2, 8  # seq == context_window (no dynamic-extension branch)

    key = jax.random.PRNGKey(0)
    pkey, ikey = jax.random.split(key)
    params = init_llama_params(pkey, cfg)
    idx = jax.random.randint(ikey, (batch, seq), 0, cfg["vocab_size"], dtype=jnp.int32)

    fwd = jax.jit(llama_forward)
    logits = jax.block_until_ready(fwd(params, idx))

    assert logits.shape == (batch, seq, cfg["vocab_size"])
    assert bool(jnp.all(jnp.isfinite(logits)))
    print("KERNEL_OK")
</pallas_src>

<mosaic_0001>
module attributes {stable_mosaic.version = 11 : i64} {
  func.func @_matmul_kernel(%arg0: i32, %arg1: memref<16x32xf32, #tpu.memory_space<vmem>>, %arg2: memref<32x192xf32, #tpu.memory_space<vmem>>, %arg3: memref<16x192xf32, #tpu.memory_space<vmem>>) attributes {dimension_semantics = [#tpu.dimension_semantics<parallel>], iteration_bounds = array<i64: 1>, scalar_prefetch = 0 : i64, scratch_operands = 0 : i64, tpu.core_type = #tpu.core_type<tc>, window_params = [{transform_indices = @transform_0, window_bounds = array<i64: 16, 32>}, {pipeline_mode = #tpu.pipeline_mode<synchronous>, transform_indices = @transform_1, window_bounds = array<i64: 32, 192>}, {transform_indices = @transform_2, window_bounds = array<i64: 16, 192>}]} {
    %c0 = arith.constant 0 : index
    %c0_0 = arith.constant 0 : index
    %0 = vector.load %arg1[%c0, %c0_0] : memref<16x32xf32, #tpu.memory_space<vmem>>, vector<16x32xf32>
    %c0_1 = arith.constant 0 : index
    %c0_2 = arith.constant 0 : index
    %1 = vector.load %arg2[%c0_1, %c0_2] : memref<32x192xf32, #tpu.memory_space<vmem>>, vector<32x192xf32>
    %cst = arith.constant dense<0.000000e+00> : vector<16x192xf32>
    %2 = tpu.matmul %0, %1, %cst {dimension_numbers = #tpu.dot_dimension_numbers<[1], [0], [0], [1], [0, 0, 1, 1], [], []>} : vector<16x32xf32>, vector<32x192xf32>, vector<16x192xf32> -> vector<16x192xf32>
    %c0_3 = arith.constant 0 : index
    %c0_4 = arith.constant 0 : index
    %3 = vector.load %arg3[%c0_3, %c0_4] : memref<16x192xf32, #tpu.memory_space<vmem>>, vector<16x192xf32>
    tpu.vector_store %arg3[%c0_3, %c0_4], %2 {strides = array<i32>} : memref<16x192xf32, #tpu.memory_space<vmem>>, vector<16x192xf32>,
    return
  }
  func.func @transform_0(%arg0: i32) -> (i32, i32) {
    %c0_i32 = arith.constant 0 : i32
    %c0_i32_0 = arith.constant 0 : i32
    return %arg0, %c0_i32 : i32, i32
  }
  func.func @transform_1(%arg0: i32) -> (i32, i32) {
    %c0_i32 = arith.constant 0 : i32
    %c0_i32_0 = arith.constant 0 : i32
    %c0_i32_1 = arith.constant 0 : i32
    return %c0_i32, %c0_i32_0 : i32, i32
  }
  func.func @transform_2(%arg0: i32) -> (i32, i32) {
    %c0_i32 = arith.constant 0 : i32
    %c0_i32_0 = arith.constant 0 : i32
    return %arg0, %c0_i32 : i32, i32
  }
}

module attributes {stable_mosaic.version = 11 : i64} {
  func.func @_rmsnorm_kernel(%arg0: i32, %arg1: memref<1x8x32xf32, #tpu.memory_space<vmem>>, %arg2: memref<8x32xf32, #tpu.memory_space<vmem>>, %arg3: memref<1x8x32xf32, #tpu.memory_space<vmem>>) attributes {dimension_semantics = [#tpu.dimension_semantics<parallel>], iteration_bounds = array<i64: 2>, scalar_prefetch = 0 : i64, scratch_operands = 0 : i64, tpu.core_type = #tpu.core_type<tc>, window_params = [{transform_indices = @transform_0, window_bounds = array<i64: 1, 8, 32>}, {pipeline_mode = #tpu.pipeline_mode<synchronous>, transform_indices = @transform_1, window_bounds = array<i64: 8, 32>}, {transform_indices = @transform_2, window_bounds = array<i64: 1, 8, 32>}]} {
    %c0 = arith.constant 0 : index
    %c0_0 = arith.constant 0 : index
    %c0_1 = arith.constant 0 : index
    %0 = vector.load %arg1[%c0, %c0_0, %c0_1] : memref<1x8x32xf32, #tpu.memory_space<vmem>>, vector<1x8x32xf32>
    %1 = vector.shape_cast %0 : vector<1x8x32xf32> to vector<8x32xf32>
    %2 = arith.mulf %1, %1 : vector<8x32xf32>
    %3 = vector.shape_cast %2 : vector<8x32xf32> to vector<1x8x32xf32>
    %cst = arith.constant dense<0.000000e+00> : vector<1xf32>
    %4 = vector.multi_reduction <add>, %3, %cst [1, 2] : vector<1x8x32xf32> to vector<1xf32>
    %5 = vector.shape_cast %4 : vector<1xf32> to vector<1x1x1xf32>
    %6 = vector.extract %5[0, 0, 0] : f32 from vector<1x1x1xf32>
    %7 = math.sqrt %6 : f32
    %cst_2 = arith.constant 6.250000e-02 : f32
    %8 = arith.mulf %7, %cst_2 : f32
    %c0_3 = arith.constant 0 : index
    %c0_4 = arith.constant 0 : index
    %9 = vector.load %arg2[%c0_3, %c0_4] : memref<8x32xf32, #tpu.memory_space<vmem>>, vector<8x32xf32>
    %10 = vector.broadcast %8 : f32 to vector<8x32xf32>
    %11 = arith.divf %1, %10 : vector<8x32xf32>
    %12 = arith.mulf %9, %11 : vector<8x32xf32>
    %c0_5 = arith.constant 0 : index
    %c0_6 = arith.constant 0 : index
    %c0_7 = arith.constant 0 : index
    %13 = vector.load %arg3[%c0_5, %c0_6, %c0_7] : memref<1x8x32xf32, #tpu.memory_space<vmem>>, vector<1x8x32xf32>
    %14 = vector.shape_cast %13 : vector<1x8x32xf32> to vector<8x32xf32>
    %15 = vector.shape_cast %12 : vector<8x32xf32> to vector<1x8x32xf32>
    tpu.vector_store %arg3[%c0_5, %c0_6, %c0_7], %15 {strides = array<i32>} : memref<1x8x32xf32, #tpu.memory_space<vmem>>, vector<1x8x32xf32>,
    return
  }
  func.func @transform_0(%arg0: i32) -> (i32, i32, i32) {
    %c0_i32 = arith.constant 0 : i32
    %c0_i32_0 = arith.constant 0 : i32
    %c0_i32_1 = arith.constant 0 : i32
    return %arg0, %c0_i32, %c0_i32_0 : i32, i32, i32
  }
  func.func @transform_1(%arg0: i32) -> (i32, i32) {
    %c0_i32 = arith.constant 0 : i32
    %c0_i32_0 = arith.constant 0 : i32
    %c0_i32_1 = arith.constant 0 : i32
    return %c0_i32, %c0_i32_0 : i32, i32
  }
  func.func @transform_2(%arg0: i32) -> (i32, i32, i32) {
    %c0_i32 = arith.constant 0 : i32
    %c0_i32_0 = arith.constant 0 : i32
    %c0_i32_1 = arith.constant 0 : i32
    return %arg0, %c0_i32, %c0_i32_0 : i32, i32, i32
  }
}

module attributes {stable_mosaic.version = 11 : i64} {
  func.func @_mha_rope_kernel(%arg0: i32, %arg1: memref<8x16xf32, #tpu.memory_space<vmem>>, %arg2: memref<8x16xf32, #tpu.memory_space<vmem>>, %arg3: memref<1x8x16xf32, #tpu.memory_space<vmem>>, %arg4: memref<1x8x16xf32, #tpu.memory_space<vmem>>, %arg5: memref<1x8x16xf32, #tpu.memory_space<vmem>>, %arg6: memref<1x8x16xf32, #tpu.memory_space<vmem>>, %arg7: memref<1x8x32xf32, #tpu.memory_space<vmem>>, %arg8: memref<1x8x32xf32, #tpu.memory_space<vmem>>) attributes {dimension_semantics = [#tpu.dimension_semantics<parallel>], iteration_bounds = array<i64: 4>, scalar_prefetch = 0 : i64, scratch_operands = 0 : i64, tpu.core_type = #tpu.core_type<tc>, window_params = [{pipeline_mode = #tpu.pipeline_mode<synchronous>, transform_indices = @transform_0, window_bounds = array<i64: 8, 16>}, {pipeline_mode = #tpu.pipeline_mode<synchronous>, transform_indices = @transform_1, window_bounds = array<i64: 8, 16>}, {transform_indices = @transform_2, window_bounds = array<i64: 1, 8, 16>}, {transform_indices = @transform_3, window_bounds = array<i64: 1, 8, 16>}, {transform_indices = @transform_4, window_bounds = array<i64: 1, 8, 16>}, {transform_indices = @transform_5, window_bounds = array<i64: 1, 8, 16>}, {transform_indices = @transform_6, window_bounds = array<i64: 1, 8, 32>}, {transform_indices = @transform_7, window_bounds = array<i64: 1, 8, 32>}]} {
    %c0 = arith.constant 0 : index
    %c0_0 = arith.constant 0 : index
    %0 = vector.load %arg1[%c0, %c0_0] : memref<8x16xf32, #tpu.memory_space<vmem>>, vector<8x16xf32>
    %c0_1 = arith.constant 0 : index
    %c0_2 = arith.constant 0 : index
    %1 = vector.load %arg2[%c0_1, %c0_2] : memref<8x16xf32, #tpu.memory_space<vmem>>, vector<8x16xf32>
    %c0_3 = arith.constant 0 : index
    %c0_4 = arith.constant 0 : index
    %c0_5 = arith.constant 0 : index
    %2 = vector.load %arg3[%c0_3, %c0_4, %c0_5] : memref<1x8x16xf32, #tpu.memory_space<vmem>>, vector<1x8x16xf32>
    %3 = vector.shape_cast %2 : vector<1x8x16xf32> to vector<8x16xf32>
    %c0_6 = arith.constant 0 : index
    %c0_7 = arith.constant 0 : index
    %c0_8 = arith.constant 0 : index
    %4 = vector.load %arg4[%c0_6, %c0_7, %c0_8] : memref<1x8x16xf32, #tpu.memory_space<vmem>>, vector<1x8x16xf32>
    %5 = vector.shape_cast %4 : vector<1x8x16xf32> to vector<8x16xf32>
    %c0_9 = arith.constant 0 : index
    %c0_10 = arith.constant 0 : index
    %c0_11 = arith.constant 0 : index
    %6 = vector.load %arg5[%c0_9, %c0_10, %c0_11] : memref<1x8x16xf32, #tpu.memory_space<vmem>>, vector<1x8x16xf32>
    %7 = vector.shape_cast %6 : vector<1x8x16xf32> to vector<8x16xf32>
    %c0_12 = arith.constant 0 : index
    %c0_13 = arith.constant 0 : index
    %c0_14 = arith.constant 0 : index
    %8 = vector.load %arg6[%c0_12, %c0_13, %c0_14] : memref<1x8x16xf32, #tpu.memory_space<vmem>>, vector<1x8x16xf32>
    %9 = vector.shape_cast %8 : vector<1x8x16xf32> to vector<8x16xf32>
    %c0_15 = arith.constant 0 : index
    %c0_16 = arith.constant 0 : index
    %c0_17 = arith.constant 0 : index
    %10 = vector.load %arg7[%c0_15, %c0_16, %c0_17] : memref<1x8x32xf32, #tpu.memory_space<vmem>>, vector<1x8x32xf32>
    %11 = vector.shape_cast %10 : vector<1x8x32xf32> to vector<8x32xf32>
    %12 = arith.mulf %3, %0 : vector<8x16xf32>
    %13 = arith.mulf %5, %1 : vector<8x16xf32>
    %14 = arith.addf %12, %13 : vector<8x16xf32>
    %15 = arith.mulf %5, %0 : vector<8x16xf32>
    %16 = arith.mulf %3, %1 : vector<8x16xf32>
    %17 = arith.subf %15, %16 : vector<8x16xf32>
    %18 = arith.mulf %7, %0 : vector<8x16xf32>
    %19 = arith.mulf %9, %1 : vector<8x16xf32>
    %20 = arith.addf %18, %19 : vector<8x16xf32>
    %21 = arith.mulf %9, %0 : vector<8x16xf32>
    %22 = arith.mulf %7, %1 : vector<8x16xf32>
    %23 = arith.subf %21, %22 : vector<8x16xf32>
    %cst = arith.constant dense<0.000000e+00> : vector<8x8xf32>
    %24 = tpu.matmul %14, %20, %cst {dimension_numbers = #tpu.dot_dimension_numbers<[1], [1], [0], [0], [0, 0, 1, 0], [], []>} : vector<8x16xf32>, vector<8x16xf32>, vector<8x8xf32> -> vector<8x8xf32>
    %cst_18 = arith.constant dense<0.000000e+00> : vector<8x8xf32>
    %25 = tpu.matmul %17, %23, %cst_18 {dimension_numbers = #tpu.dot_dimension_numbers<[1], [1], [0], [0], [0, 0, 1, 0], [], []>} : vector<8x16xf32>, vector<8x16xf32>, vector<8x8xf32> -> vector<8x8xf32>
    %26 = arith.addf %24, %25 : vector<8x8xf32>
    %cst_19 = arith.constant 0.176776692 : f32
    %27 = vector.broadcast %cst_19 : f32 to vector<8x8xf32>
    %28 = arith.mulf %26, %27 : vector<8x8xf32>
    %29 = tpu.iota {dimensions = array<i32: 0>} : vector<8x8xi32>
    %30 = tpu.iota {dimensions = array<i32: 1>} : vector<8x8xi32>
    %31 = arith.cmpi sle, %30, %29 : vector<8x8xi32>
    %cst_20 = arith.constant -1.000000e+30 : f32
    %32 = vector.broadcast %cst_20 : f32 to vector<8x8xf32>
    %33 = arith.select %31, %28, %32 : vector<8x8xi1>, vector<8x8xf32>
    %cst_21 = arith.constant dense<0xFF800000> : vector<8xf32>
    %34 = vector.multi_reduction <maximumf>, %33, %cst_21 [1] : vector<8x8xf32> to vector<8xf32>
    %35 = vector.shape_cast %34 : vector<8xf32> to vector<8x1xf32>
    %36 = vector.broadcast %35 : vector<8x1xf32> to vector<8x8xf32>
    %37 = arith.subf %33, %36 : vector<8x8xf32>
    %38 = math.exp %37 : vector<8x8xf32>
    %cst_22 = arith.constant dense<0.000000e+00> : vector<8xf32>
    %39 = vector.multi_reduction <add>, %38, %cst_22 [1] : vector<8x8xf32> to vector<8xf32>
    %40 = vector.shape_cast %39 : vector<8xf32> to vector<8x1xf32>
    %41 = vector.broadcast %40 : vector<8x1xf32> to vector<8x8xf32>
    %42 = arith.divf %38, %41 : vector<8x8xf32>
    %cst_23 = arith.constant dense<0.000000e+00> : vector<8x32xf32>
    %43 = tpu.matmul %42, %11, %cst_23 {dimension_numbers = #tpu.dot_dimension_numbers<[1], [0], [0], [1], [0, 0, 1, 1], [], []>} : vector<8x8xf32>, vector<8x32xf32>, vector<8x32xf32> -> vector<8x32xf32>
    %c0_24 = arith.constant 0 : index
    %c0_25 = arith.constant 0 : index
    %c0_26 = arith.constant 0 : index
    %44 = vector.load %arg8[%c0_24, %c0_25, %c0_26] : memref<1x8x32xf32, #tpu.memory_space<vmem>>, vector<1x8x32xf32>
    %45 = vector.shape_cast %44 : vector<1x8x32xf32> to vector<8x32xf32>
    %46 = vector.shape_cast %43 : vector<8x32xf32> to vector<1x8x32xf32>
    tpu.vector_store %arg8[%c0_24, %c0_25, %c0_26], %46 {strides = array<i32>} : memref<1x8x32xf32, #tpu.memory_space<vmem>>, vector<1x8x32xf32>,
    return
  }
  func.func @transform_0(%arg0: i32) -> (i32, i32) {
    %c0_i32 = arith.constant 0 : i32
    %c0_i32_0 = arith.constant 0 : i32
    %c0_i32_1 = arith.constant 0 : i32
    return %c0_i32, %c0_i32_0 : i32, i32
  }
  func.func @transform_1(%arg0: i32) -> (i32, i32) {
    %c0_i32 = arith.constant 0 : i32
    %c0_i32_0 = arith.constant 0 : i32
    %c0_i32_1 = arith.constant 0 : i32
    return %c0_i32, %c0_i32_0 : i32, i32
  }
  func.func @transform_2(%arg0: i32) -> (i32, i32, i32) {
    %c0_i32 = arith.constant 0 : i32
    %c0_i32_0 = arith.constant 0 : i32
    %c0_i32_1 = arith.constant 0 : i32
    return %arg0, %c0_i32, %c0_i32_0 : i32, i32, i32
  }
  func.func @transform_3(%arg0: i32) -> (i32, i32, i32) {
    %c0_i32 = arith.constant 0 : i32
    %c0_i32_0 = arith.constant 0 : i32
    %c0_i32_1 = arith.constant 0 : i32
    return %arg0, %c0_i32, %c0_i32_0 : i32, i32, i32
  }
  func.func @transform_4(%arg0: i32) -> (i32, i32, i32) {
    %c0_i32 = arith.constant 0 : i32
    %c0_i32_0 = arith.constant 0 : i32
    %c0_i32_1 = arith.constant 0 : i32
    return %arg0, %c0_i32, %c0_i32_0 : i32, i32, i32
  }
  func.func @transform_5(%arg0: i32) -> (i32, i32, i32) {
    %c0_i32 = arith.constant 0 : i32
    %c0_i32_0 = arith.constant 0 : i32
    %c0_i32_1 = arith.constant 0 : i32
    return %arg0, %c0_i32, %c0_i32_0 : i32, i32, i32
  }
  func.func @transform_6(%arg0: i32) -> (i32, i32, i32) {
    %c0_i32 = arith.constant 0 : i32
    %c0_i32_0 = arith.constant 0 : i32
    %c0_i32_1 = arith.constant 0 : i32
    return %arg0, %c0_i32, %c0_i32_0 : i32, i32, i32
  }
  func.func @transform_7(%arg0: i32) -> (i32, i32, i32) {
    %c0_i32 = arith.constant 0 : i32
    %c0_i32_0 = arith.constant 0 : i32
    %c0_i32_1 = arith.constant 0 : i32
    return %arg0, %c0_i32, %c0_i32_0 : i32, i32, i32
  }
}

module attributes {stable_mosaic.version = 11 : i64} {
  func.func @_matmul_bias_kernel(%arg0: i32, %arg1: memref<16x64xf32, #tpu.memory_space<vmem>>, %arg2: memref<64x32xf32, #tpu.memory_space<vmem>>, %arg3: memref<1x32xf32, #tpu.memory_space<vmem>>, %arg4: memref<16x32xf32, #tpu.memory_space<vmem>>) attributes {dimension_semantics = [#tpu.dimension_semantics<parallel>], iteration_bounds = array<i64: 1>, scalar_prefetch = 0 : i64, scratch_operands = 0 : i64, tpu.core_type = #tpu.core_type<tc>, window_params = [{transform_indices = @transform_0, window_bounds = array<i64: 16, 64>}, {pipeline_mode = #tpu.pipeline_mode<synchronous>, transform_indices = @transform_1, window_bounds = array<i64: 64, 32>}, {pipeline_mode = #tpu.pipeline_mode<synchronous>, transform_indices = @transform_2, window_bounds = array<i64: 1, 32>}, {transform_indices = @transform_3, window_bounds = array<i64: 16, 32>}]} {
    %c0 = arith.constant 0 : index
    %c0_0 = arith.constant 0 : index
    %0 = vector.load %arg1[%c0, %c0_0] : memref<16x64xf32, #tpu.memory_space<vmem>>, vector<16x64xf32>
    %c0_1 = arith.constant 0 : index
    %c0_2 = arith.constant 0 : index
    %1 = vector.load %arg2[%c0_1, %c0_2] : memref<64x32xf32, #tpu.memory_space<vmem>>, vector<64x32xf32>
    %cst = arith.constant dense<0.000000e+00> : vector<16x32xf32>
    %2 = tpu.matmul %0, %1, %cst {dimension_numbers = #tpu.dot_dimension_numbers<[1], [0], [0], [1], [0, 0, 1, 1], [], []>} : vector<16x64xf32>, vector<64x32xf32>, vector<16x32xf32> -> vector<16x32xf32>
    %c0_3 = arith.constant 0 : index
    %c0_4 = arith.constant 0 : index
    %3 = vector.load %arg3[%c0_3, %c0_4] : memref<1x32xf32, #tpu.memory_space<vmem>>, vector<1x32xf32>
    %4 = vector.broadcast %3 : vector<1x32xf32> to vector<16x32xf32>
    %5 = arith.addf %2, %4 : vector<16x32xf32>
    %c0_5 = arith.constant 0 : index
    %c0_6 = arith.constant 0 : index
    %6 = vector.load %arg4[%c0_5, %c0_6] : memref<16x32xf32, #tpu.memory_space<vmem>>, vector<16x32xf32>
    tpu.vector_store %arg4[%c0_5, %c0_6], %5 {strides = array<i32>} : memref<16x32xf32, #tpu.memory_space<vmem>>, vector<16x32xf32>,
    return
  }
  func.func @transform_0(%arg0: i32) -> (i32, i32) {
    %c0_i32 = arith.constant 0 : i32
    %c0_i32_0 = arith.constant 0 : i32
    return %arg0, %c0_i32 : i32, i32
  }
  func.func @transform_1(%arg0: i32) -> (i32, i32) {
    %c0_i32 = arith.constant 0 : i32
    %c0_i32_0 = arith.constant 0 : i32
    %c0_i32_1 = arith.constant 0 : i32
    return %c0_i32, %c0_i32_0 : i32, i32
  }
  func.func @transform_2(%arg0: i32) -> (i32, i32) {
    %c0_i32 = arith.constant 0 : i32
    %c0_i32_0 = arith.constant 0 : i32
    %c0_i32_1 = arith.constant 0 : i32
    return %c0_i32, %c0_i32_0 : i32, i32
  }
  func.func @transform_3(%arg0: i32) -> (i32, i32) {
    %c0_i32 = arith.constant 0 : i32
    %c0_i32_0 = arith.constant 0 : i32
    return %arg0, %c0_i32 : i32, i32
  }
}

module attributes {stable_mosaic.version = 11 : i64} {
  func.func @_matmul_bias_kernel(%arg0: i32, %arg1: memref<16x32xf32, #tpu.memory_space<vmem>>, %arg2: memref<32x32xf32, #tpu.memory_space<vmem>>, %arg3: memref<1x32xf32, #tpu.memory_space<vmem>>, %arg4: memref<16x32xf32, #tpu.memory_space<vmem>>) attributes {dimension_semantics = [#tpu.dimension_semantics<parallel>], iteration_bounds = array<i64: 1>, scalar_prefetch = 0 : i64, scratch_operands = 0 : i64, tpu.core_type = #tpu.core_type<tc>, window_params = [{transform_indices = @transform_0, window_bounds = array<i64: 16, 32>}, {pipeline_mode = #tpu.pipeline_mode<synchronous>, transform_indices = @transform_1, window_bounds = array<i64: 32, 32>}, {pipeline_mode = #tpu.pipeline_mode<synchronous>, transform_indices = @transform_2, window_bounds = array<i64: 1, 32>}, {transform_indices = @transform_3, window_bounds = array<i64: 16, 32>}]} {
    %c0 = arith.constant 0 : index
    %c0_0 = arith.constant 0 : index
    %0 = vector.load %arg1[%c0, %c0_0] : memref<16x32xf32, #tpu.memory_space<vmem>>, vector<16x32xf32>
    %c0_1 = arith.constant 0 : index
    %c0_2 = arith.constant 0 : index
    %1 = vector.load %arg2[%c0_1, %c0_2] : memref<32x32xf32, #tpu.memory_space<vmem>>, vector<32x32xf32>
    %cst = arith.constant dense<0.000000e+00> : vector<16x32xf32>
    %2 = tpu.matmul %0, %1, %cst {dimension_numbers = #tpu.dot_dimension_numbers<[1], [0], [0], [1], [0, 0, 1, 1], [], []>} : vector<16x32xf32>, vector<32x32xf32>, vector<16x32xf32> -> vector<16x32xf32>
    %c0_3 = arith.constant 0 : index
    %c0_4 = arith.constant 0 : index
    %3 = vector.load %arg3[%c0_3, %c0_4] : memref<1x32xf32, #tpu.memory_space<vmem>>, vector<1x32xf32>
    %4 = vector.broadcast %3 : vector<1x32xf32> to vector<16x32xf32>
    %5 = arith.addf %2, %4 : vector<16x32xf32>
    %c0_5 = arith.constant 0 : index
    %c0_6 = arith.constant 0 : index
    %6 = vector.load %arg4[%c0_5, %c0_6] : memref<16x32xf32, #tpu.memory_space<vmem>>, vector<16x32xf32>
    tpu.vector_store %arg4[%c0_5, %c0_6], %5 {strides = array<i32>} : memref<16x32xf32, #tpu.memory_space<vmem>>, vector<16x32xf32>,
    return
  }
  func.func @transform_0(%arg0: i32) -> (i32, i32) {
    %c0_i32 = arith.constant 0 : i32
    %c0_i32_0 = arith.constant 0 : i32
    return %arg0, %c0_i32 : i32, i32
  }
  func.func @transform_1(%arg0: i32) -> (i32, i32) {
    %c0_i32 = arith.constant 0 : i32
    %c0_i32_0 = arith.constant 0 : i32
    %c0_i32_1 = arith.constant 0 : i32
    return %c0_i32, %c0_i32_0 : i32, i32
  }
  func.func @transform_2(%arg0: i32) -> (i32, i32) {
    %c0_i32 = arith.constant 0 : i32
    %c0_i32_0 = arith.constant 0 : i32
    %c0_i32_1 = arith.constant 0 : i32
    return %c0_i32, %c0_i32_0 : i32, i32
  }
  func.func @transform_3(%arg0: i32) -> (i32, i32) {
    %c0_i32 = arith.constant 0 : i32
    %c0_i32_0 = arith.constant 0 : i32
    return %arg0, %c0_i32 : i32, i32
  }
}

module attributes {stable_mosaic.version = 11 : i64} {
  func.func @_swiglu_kernel(%arg0: i32, %arg1: memref<16x32xf32, #tpu.memory_space<vmem>>, %arg2: memref<32x32xf32, #tpu.memory_space<vmem>>, %arg3: memref<1x32xf32, #tpu.memory_space<vmem>>, %arg4: memref<32x32xf32, #tpu.memory_space<vmem>>, %arg5: memref<1x32xf32, #tpu.memory_space<vmem>>, %arg6: memref<1xf32, #tpu.memory_space<smem>>, %arg7: memref<16x32xf32, #tpu.memory_space<vmem>>) attributes {dimension_semantics = [#tpu.dimension_semantics<parallel>], iteration_bounds = array<i64: 1>, scalar_prefetch = 0 : i64, scratch_operands = 0 : i64, tpu.core_type = #tpu.core_type<tc>, window_params = [{transform_indices = @transform_0, window_bounds = array<i64: 16, 32>}, {pipeline_mode = #tpu.pipeline_mode<synchronous>, transform_indices = @transform_1, window_bounds = array<i64: 32, 32>}, {pipeline_mode = #tpu.pipeline_mode<synchronous>, transform_indices = @transform_2, window_bounds = array<i64: 1, 32>}, {pipeline_mode = #tpu.pipeline_mode<synchronous>, transform_indices = @transform_3, window_bounds = array<i64: 32, 32>}, {pipeline_mode = #tpu.pipeline_mode<synchronous>, transform_indices = @transform_4, window_bounds = array<i64: 1, 32>}, {transform_indices = @transform_5, window_bounds = array<i64: 1>}, {transform_indices = @transform_6, window_bounds = array<i64: 16, 32>}]} {
    %c0 = arith.constant 0 : index
    %c0_0 = arith.constant 0 : index
    %0 = vector.load %arg1[%c0, %c0_0] : memref<16x32xf32, #tpu.memory_space<vmem>>, vector<16x32xf32>
    %c0_1 = arith.constant 0 : index
    %c0_2 = arith.constant 0 : index
    %1 = vector.load %arg2[%c0_1, %c0_2] : memref<32x32xf32, #tpu.memory_space<vmem>>, vector<32x32xf32>
    %cst = arith.constant dense<0.000000e+00> : vector<16x32xf32>
    %2 = tpu.matmul %0, %1, %cst {dimension_numbers = #tpu.dot_dimension_numbers<[1], [0], [0], [1], [0, 0, 1, 1], [], []>} : vector<16x32xf32>, vector<32x32xf32>, vector<16x32xf32> -> vector<16x32xf32>
    %c0_3 = arith.constant 0 : index
    %c0_4 = arith.constant 0 : index
    %3 = vector.load %arg3[%c0_3, %c0_4] : memref<1x32xf32, #tpu.memory_space<vmem>>, vector<1x32xf32>
    %4 = vector.broadcast %3 : vector<1x32xf32> to vector<16x32xf32>
    %5 = arith.addf %2, %4 : vector<16x32xf32>
    %c0_5 = arith.constant 0 : index
    %c0_6 = arith.constant 0 : index
    %6 = vector.load %arg4[%c0_5, %c0_6] : memref<32x32xf32, #tpu.memory_space<vmem>>, vector<32x32xf32>
    %cst_7 = arith.constant dense<0.000000e+00> : vector<16x32xf32>
    %7 = tpu.matmul %0, %6, %cst_7 {dimension_numbers = #tpu.dot_dimension_numbers<[1], [0], [0], [1], [0, 0, 1, 1], [], []>} : vector<16x32xf32>, vector<32x32xf32>, vector<16x32xf32> -> vector<16x32xf32>
    %c0_8 = arith.constant 0 : index
    %c0_9 = arith.constant 0 : index
    %8 = vector.load %arg5[%c0_8, %c0_9] : memref<1x32xf32, #tpu.memory_space<vmem>>, vector<1x32xf32>
    %9 = vector.broadcast %8 : vector<1x32xf32> to vector<16x32xf32>
    %10 = arith.addf %7, %9 : vector<16x32xf32>
    %c0_10 = arith.constant 0 : index
    %11 = memref.load %arg6[%c0_10] : memref<1xf32, #tpu.memory_space<smem>>
    %12 = vector.broadcast %11 : f32 to vector<16x32xf32>
    %13 = arith.mulf %12, %5 : vector<16x32xf32>
    %14 = arith.negf %13 : vector<16x32xf32>
    %15 = math.exp %14 : vector<16x32xf32>
    %cst_11 = arith.constant 1.000000e+00 : f32
    %16 = vector.broadcast %cst_11 : f32 to vector<16x32xf32>
    %17 = arith.addf %16, %15 : vector<16x32xf32>
    %18 = arith.divf %16, %17 : vector<16x32xf32>
    %19 = arith.mulf %5, %18 : vector<16x32xf32>
    %20 = arith.mulf %19, %10 : vector<16x32xf32>
    %c0_12 = arith.constant 0 : index
    %c0_13 = arith.constant 0 : index
    %21 = vector.load %arg7[%c0_12, %c0_13] : memref<16x32xf32, #tpu.memory_space<vmem>>, vector<16x32xf32>
    tpu.vector_store %arg7[%c0_12, %c0_13], %20 {strides = array<i32>} : memref<16x32xf32, #tpu.memory_space<vmem>>, vector<16x32xf32>,
    return
  }
  func.func @transform_0(%arg0: i32) -> (i32, i32) {
    %c0_i32 = arith.constant 0 : i32
    %c0_i32_0 = arith.constant 0 : i32
    return %arg0, %c0_i32 : i32, i32
  }
  func.func @transform_1(%arg0: i32) -> (i32, i32) {
    %c0_i32 = arith.constant 0 : i32
    %c0_i32_0 = arith.constant 0 : i32
    %c0_i32_1 = arith.constant 0 : i32
    return %c0_i32, %c0_i32_0 : i32, i32
  }
  func.func @transform_2(%arg0: i32) -> (i32, i32) {
    %c0_i32 = arith.constant 0 : i32
    %c0_i32_0 = arith.constant 0 : i32
    %c0_i32_1 = arith.constant 0 : i32
    return %c0_i32, %c0_i32_0 : i32, i32
  }
  func.func @transform_3(%arg0: i32) -> (i32, i32) {
    %c0_i32 = arith.constant 0 : i32
    %c0_i32_0 = arith.constant 0 : i32
    %c0_i32_1 = arith.constant 0 : i32
    return %c0_i32, %c0_i32_0 : i32, i32
  }
  func.func @transform_4(%arg0: i32) -> (i32, i32) {
    %c0_i32 = arith.constant 0 : i32
    %c0_i32_0 = arith.constant 0 : i32
    %c0_i32_1 = arith.constant 0 : i32
    return %c0_i32, %c0_i32_0 : i32, i32
  }
  func.func @transform_5(%arg0: i32) -> i32 {
    %c0_i32 = arith.constant 0 : i32
    %c0_i32_0 = arith.constant 0 : i32
    return %c0_i32 : i32
  }
  func.func @transform_6(%arg0: i32) -> (i32, i32) {
    %c0_i32 = arith.constant 0 : i32
    %c0_i32_0 = arith.constant 0 : i32
    return %arg0, %c0_i32 : i32, i32
  }
}

module attributes {stable_mosaic.version = 11 : i64} {
  func.func @_matmul_bias_kernel(%arg0: i32, %arg1: memref<16x32xf32, #tpu.memory_space<vmem>>, %arg2: memref<32x64xf32, #tpu.memory_space<vmem>>, %arg3: memref<1x64xf32, #tpu.memory_space<vmem>>, %arg4: memref<16x64xf32, #tpu.memory_space<vmem>>) attributes {dimension_semantics = [#tpu.dimension_semantics<parallel>], iteration_bounds = array<i64: 1>, scalar_prefetch = 0 : i64, scratch_operands = 0 : i64, tpu.core_type = #tpu.core_type<tc>, window_params = [{transform_indices = @transform_0, window_bounds = array<i64: 16, 32>}, {pipeline_mode = #tpu.pipeline_mode<synchronous>, transform_indices = @transform_1, window_bounds = array<i64: 32, 64>}, {pipeline_mode = #tpu.pipeline_mode<synchronous>, transform_indices = @transform_2, window_bounds = array<i64: 1, 64>}, {transform_indices = @transform_3, window_bounds = array<i64: 16, 64>}]} {
    %c0 = arith.constant 0 : index
    %c0_0 = arith.constant 0 : index
    %0 = vector.load %arg1[%c0, %c0_0] : memref<16x32xf32, #tpu.memory_space<vmem>>, vector<16x32xf32>
    %c0_1 = arith.constant 0 : index
    %c0_2 = arith.constant 0 : index
    %1 = vector.load %arg2[%c0_1, %c0_2] : memref<32x64xf32, #tpu.memory_space<vmem>>, vector<32x64xf32>
    %cst = arith.constant dense<0.000000e+00> : vector<16x64xf32>
    %2 = tpu.matmul %0, %1, %cst {dimension_numbers = #tpu.dot_dimension_numbers<[1], [0], [0], [1], [0, 0, 1, 1], [], []>} : vector<16x32xf32>, vector<32x64xf32>, vector<16x64xf32> -> vector<16x64xf32>
    %c0_3 = arith.constant 0 : index
    %c0_4 = arith.constant 0 : index
    %3 = vector.load %arg3[%c0_3, %c0_4] : memref<1x64xf32, #tpu.memory_space<vmem>>, vector<1x64xf32>
    %4 = vector.broadcast %3 : vector<1x64xf32> to vector<16x64xf32>
    %5 = arith.addf %2, %4 : vector<16x64xf32>
    %c0_5 = arith.constant 0 : index
    %c0_6 = arith.constant 0 : index
    %6 = vector.load %arg4[%c0_5, %c0_6] : memref<16x64xf32, #tpu.memory_space<vmem>>, vector<16x64xf32>
    tpu.vector_store %arg4[%c0_5, %c0_6], %5 {strides = array<i32>} : memref<16x64xf32, #tpu.memory_space<vmem>>, vector<16x64xf32>,
    return
  }
  func.func @transform_0(%arg0: i32) -> (i32, i32) {
    %c0_i32 = arith.constant 0 : i32
    %c0_i32_0 = arith.constant 0 : i32
    return %arg0, %c0_i32 : i32, i32
  }
  func.func @transform_1(%arg0: i32) -> (i32, i32) {
    %c0_i32 = arith.constant 0 : i32
    %c0_i32_0 = arith.constant 0 : i32
    %c0_i32_1 = arith.constant 0 : i32
    return %c0_i32, %c0_i32_0 : i32, i32
  }
  func.func @transform_2(%arg0: i32) -> (i32, i32) {
    %c0_i32 = arith.constant 0 : i32
    %c0_i32_0 = arith.constant 0 : i32
    %c0_i32_1 = arith.constant 0 : i32
    return %c0_i32, %c0_i32_0 : i32, i32
  }
  func.func @transform_3(%arg0: i32) -> (i32, i32) {
    %c0_i32 = arith.constant 0 : i32
    %c0_i32_0 = arith.constant 0 : i32
    return %arg0, %c0_i32 : i32, i32
  }
}

</mosaic_0001>

<bundles_post_ra>
// kernel: llama_forward.17
= control target key start
LH: loop header
LB: loop body
LE: loop exit
PB: predicated region body
PF: predicated region fallthrough
CT: control target
= control target key end

     0   :  { %s269_s9 = smov 0   ;;  %s298_s0 = inlined_call_operand.vmem [shape: f32[2,8,32], index: 0, kind: input, shape index: {}]   ;;  %s299_s1 = inlined_call_operand.vmem [shape: f32[8,32], index: 1, kind: input, shape index: {}]   ;;  %s300_s2 = inlined_call_operand.vmem [shape: f32[2,8,32], index: 2, kind: output, shape index: {}]  }
   0x1 LB: > { %s221_s10 = sadd.s32 4294967295, %s252_s9   ;;  %p225_p0 = scmp.ge.s32.totalorder %s252_s9, 1  ;;  %s252_s9 = sphi %s269_s9, %s12_s9  }
   0x2   : > { %p111_p1 = scmp.lt.s32.totalorder %s252_s9, 3 }
   0x4   : > { %p112_p2 = pnand %p225_p0, %p111_p1 }
   0x5   : > { %p131_p3 = scmp.lt.s32.totalorder (!%p112_p2), %s221_s10, 1  ;;  %vm141_vm0 = vcmask (!%p112_p2), 261120   ;;  %v162_v18 = vld [vmem:[%s299_s1] sm:$0xff] (!%p112_p2) }
   0x6   : > { %115 = sbr.rel (%p112_p2) target bundleno = 309 (0x135), region = 28 }
   0xd   : > { %s302_s10 = smov (!%p131_p3, %s221_s10), 1 }
   0xe   : > { %s226_s11 = sshll.u32 %s302_s10, 3 }
   0xf   : > { %s134_s14 = scalar_lea.vmem %s298_s0, %s226_s11  ;;  %s138_s22 = scalar_lea.vmem %s300_s2, %s226_s11 }
  0x10   : > { %v139_v0 = vld [vmem:[%s134_s14] sm:$0xff] }
  0x11   : > { %v140_v1 = vmul.f32 %v139_v0, %v139_v0 }
  0x13   : > { %v142_v2 = vsel %vm141_vm0, %v140_v1, 0.0 }
  0x14   : > { %143 = vadd.xlane.f32.xlu0 %v142_v2 }
  0xa1   : > { %v144_v3 = vpop.xlane.xlu0 %143 }
  0xa2   : > { %v145_v4 = vrot.slane %v144_v3, 4 }
  0xa4   : > { %v146_v5 = vadd.f32 %v145_v4, %v144_v3 }
  0xa6   : > { %v147_v6 = vrot.slane %v146_v5, 2 }
  0xa8   : > { %v148_v7 = vadd.f32 %v147_v6, %v146_v5 }
  0xaa   : > { %v149_v8 = vrot.slane %v148_v7, 1 }
  0xac   : > { %v150_v9 = vadd.f32 %v149_v8, %v148_v7 }
  0xae   : > { %230 = vpush %v150_v9 }
  0xdf   : > { %s231_s15 = spop %230 }
  0xe0   : > { %v152_v10 = vstv %s231_s15 }
  0xe1   : > { %242 = vrsqrt.f32 %v152_v10  ;;  %vm155_vm1 = vcmp.eq.f32.partialorder %v152_v10, inf  ;;  %v158_v13 = vand.u32 2147483648, %v152_v10  ;;  %vm157_vm2 = vcmp.eq.f32.partialorder %v152_v10, 0.0 }
  0xeb   : > { %v243_v11 = vpop.eup %242 }
  0xec   : > { %v154_v12 = vmul.f32 %v243_v11, %v152_v10 }
  0xee   : > { %v156_v14 = vsel %vm155_vm1, %v152_v10, %v154_v12 }
  0xef   : > { %v159_v15 = vsel %vm157_vm2, %v158_v13, %v156_v14 }
  0xf0   : > { %232 = vpush %v159_v15 }
 0x121   : > { %s233_s16 = spop %232 }
 0x122   : > { %s161_s17 = smul.f32 0.0625, %s233_s16 }
 0x124   : > { %v163_v16 = vstv %s161_s17 }
 0x125   : > { %244 = vrcp.f32 %v163_v16 }
 0x12f   : > { %v245_v17 = vpop.eup %244 }
 0x130   : > { %v165_v19 = vmul.f32 %v245_v17, %v139_v0 }
 0x132   : > { %v166_v20 = vmul.f32 %v165_v19, %v162_v18 }
 0x134   : > { %167 = vst.msk [vmem:[%s138_s22] sm:$0xff] %vm141_vm0, %v166_v20 }
 0x135 PF: > { %s12_s9 = sadd.s32 1, %s252_s9  }
 0x136   : > { %p9_p4 = scmp.ge.s32.totalorder %s12_s9, 4  }
 0x138   :  { %11 = sbr.rel (!%p9_p4) target bundleno = 1 (0x1), region = 58 }

// kernel: llama_forward.18
= control target key start
LH: loop header
LB: loop body
LE: loop exit
PB: predicated region body
PF: predicated region fallthrough
CT: control target
= control target key end

     0   :  { %v129_v3 = vmov 0.0   ;;  %vm21_vm0 = vcmask 261120   ;;  %vm106_vm1 = vcmask 523264   ;;  %s187_s1 = inlined_call_operand.vmem [shape: f32[32,192], index: 1, kind: input, shape index: {}]   ;;  %s188_s0 = inlined_call_operand.vmem [shape: f32[16,32], index: 0, kind: input, shape index: {}]   ;;  %s189_s2 = inlined_call_operand.vmem [shape: f32[16,192], index: 2, kind: output, shape index: {}]  }
   0x1   :  { %v14_v0 = vld [vmem:[%s187_s1 + $0x8] sm:$0xff]  ;;  %v16_v1 = vld [vmem:[%s187_s1 + $0x18] sm:$0xff]  ;;  %v13_v2 = vld [vmem:[%s187_s1] sm:$0xff]  ;;  %92 = vmatprep.mubr.f32.mxu0 %v129_v3  ;;  %98 = vmatprep.mubr.f32.mxu1 %v129_v3 }
   0x2   :  { %v116_v4 = vpack.c.bf16 %v16_v1, %v14_v0  ;;  %v15_v5 = vld [vmem:[%s187_s1 + $0x10] sm:$0xff]  ;;  %v18_v6 = vld [vmem:[%s187_s1 + $0x28] sm:$0xff]  ;;  %v20_v7 = vld [vmem:[%s187_s1 + $0x38] sm:$0xff] }
   0x3   :  { %v118_v8 = vpack.c.bf16 %v15_v5, %v13_v2  ;;  %v120_v9 = vpack.c.bf16 %v20_v7, %v18_v6  ;;  %v17_v10 = vld [vmem:[%s187_s1 + $0x20] sm:$0xff]  ;;  %v19_v11 = vld [vmem:[%s187_s1 + $0x30] sm:$0xff]  ;;  %v12_v14 = vld [vmem:[%s188_s0 + $0x8] sm:$0xff] }
   0x4   :  { %117 = vmatprep.subr.bf16.mxu0 %v116_v4  ;;  %124 = vmatprep.subr.bf16.mxu1 %v116_v4  ;;  %v122_v12 = vpack.c.bf16 %v19_v11, %v17_v10  ;;  %v11_v13 = vld [vmem:[%s188_s0] sm:$0xff] }
   0x5   :  { %119 = vmatpush1.bf16.msra.mxu0 %v118_v8  ;;  %126 = vmatpush1.bf16.msra.mxu1 %v118_v8 }
   0x6   :  { %121 = vmatprep.subr.bf16.mxu0 %v120_v9  ;;  %125 = vmatprep.subr.bf16.mxu1 %v120_v9 }
   0x9   :  { %123 = vmatpush1.bf16.msra.mxu0 %v122_v12  ;;  %127 = vmatpush1.bf16.msra.mxu1 %v122_v12 }
   0xc   :  { %114 = vmatmul.mubr.msk.f32.vlgmr.msra.gmra.mrb[0].mxu0 %vm21_vm0, %v11_v13  ;;  %115 = vmatmul.mubr.msk.f32.vlgmr.msra.gmra.mrb[0].mxu1 %vm21_vm0, %v12_v14 }
  0xdf   :  { %v94_v15 = vpop.f32.mrb[0].mxu0  ;;  %v100_v16 = vpop.f32.mrb[0].mxu1 }
  0xe0   :  { %105 = vst [vmem:[%s189_s2] sm:$0xff] %v94_v15  ;;  %108 = vst [vmem:[%s189_s2 + $0x10] sm:$0xff] %v100_v16  ;;  %v96_v17 = vpop.f32.mrb[1].mxu0  ;;  %v102_v18 = vpop.f32.mrb[1].mxu1 }
  0xe1   :  { %107 = vst.msk [vmem:[%s189_s2 + $0x8] sm:$0xff] %vm106_vm1, %v96_v17  ;;  %109 = vst.msk [vmem:[%s189_s2 + $0x18] sm:$0xff] %vm106_vm1, %v102_v18 }

// kernel: llama_forward.19
= control target key start
LH: loop header
LB: loop body
LE: loop exit
PB: predicated region body
PF: predicated region fallthrough
CT: control target
= control target key end

     0   :  { %s814_s24 = smov 0   ;;  %s863_s0 = inlined_call_operand.vmem [shape: f32[8,16], index: 0, kind: input, shape index: {}]   ;;  %s864_s1 = inlined_call_operand.vmem [shape: f32[8,16], index: 1, kind: input, shape index: {}]   ;;  %s865_s2 = inlined_call_operand.vmem [shape: f32[4,8,16], index: 2, kind: input, shape index: {}]   ;;  %s866_s3 = inlined_call_operand.vmem [shape: f32[4,8,16], index: 3, kind: input, shape index: {}]   ;;  %s867_s4 = inlined_call_operand.vmem [shape: f32[4,8,16], index: 4, kind: input, shape index: {}]   ;;  %s868_s5 = inlined_call_operand.vmem [shape: f32[4,8,16], index: 5, kind: input, shape index: {}]   ;;  %s869_s6 = inlined_call_operand.vmem [shape: f32[4,8,32], index: 6, kind: input, shape index: {}]   ;;  %s870_s7 = inlined_call_operand.vmem [shape: f32[4,8,32], index: 7, kind: output, shape index: {}]  }
   0x1 LB: > { %s709_s25 = sadd.s32 4294967295, %s770_s24   ;;  %p713_p0 = scmp.ge.s32.totalorder %s770_s24, 1  ;;  %s770_s24 = sphi %s814_s24, %s17_s24  }
   0x2   : > { %p272_p1 = scmp.lt.s32.totalorder %s770_s24, 5 }
   0x4   : > { %p273_p2 = pnand %p713_p0, %p272_p1 }
   0x5   : > { %p318_p3 = scmp.lt.s32.totalorder (!%p273_p2), %s709_s25, 3  ;;  %v772_v0 = vmov (!%p273_p2), 0.0   ;;  %vm773_vm0 = vmmov (!%p273_p2), 0   ;;  %v342_v1 = vld [vmem:[%s863_s0] sm:$0xff] (!%p273_p2)  ;;  %vm361_vm1 = vcmask (!%p273_p2), 130048   ;;  %v515_v19 = vlaneseq (!%p273_p2) }
   0x6   : > { %276 = sbr.rel (%p273_p2) target bundleno = 775 (0x307), region = 48  ;;  %733 = vmatprep.subr.mxu0 (!%p273_p2), %v772_v0  ;;  %735 = vmatprep.mubr.msk.f32.mxu0 (!%p273_p2), %vm773_vm0, %v772_v0  ;;  %v343_v2 = vld [vmem:[%s864_s1] sm:$0xff] (!%p273_p2)  ;;  %vm521_vm3 = vcmask (!%p273_p2), 64512   ;;  %vm606_vm4 = vcmask (!%p273_p2), 261120  }
   0x7   : > { %743 = vmatprep.subr.mxu1 (!%p273_p2), %v772_v0  ;;  %745 = vmatprep.mubr.msk.f32.mxu1 (!%p273_p2), %vm773_vm0, %v772_v0  ;;  %v516_v20 = vshrl.u32 (!%p273_p2), %v515_v19, 7  ;;  %v518_v21 = vand.u32 (!%p273_p2), 127, %v515_v19 }
   0x9   : > { %vm519_vm2 = vcmp.le.s32.totalorder (!%p273_p2), %v518_v21, %v516_v20 }
   0xd   : > { %s872_s25 = smov (!%p318_p3, %s709_s25), 3 }
   0xe   : > { %s824_s26 = sshll.u32 %s872_s25, 3 }
   0xf   : > { %s329_s10 = scalar_lea.vmem %s867_s4, %s824_s26  ;;  %s333_s13 = scalar_lea.vmem %s868_s5, %s824_s26 }
  0x10   : > { %v346_v3 = vld [vmem:[%s329_s10] sm:$0xff]  ;;  %s321_s16 = scalar_lea.vmem %s865_s2, %s824_s26  ;;  %s325_s19 = scalar_lea.vmem %s866_s3, %s824_s26 }
  0x11   : > { %v347_v4 = vld [vmem:[%s333_s13] sm:$0xff]  ;;  %v355_v5 = vmul.f32 %v346_v3, %v342_v1  ;;  %v359_v8 = vmul.f32 %v346_v3, %v343_v2  ;;  %s337_s22 = scalar_lea.vmem %s869_s6, %s824_s26  ;;  %s341_s27 = scalar_lea.vmem %s870_s7, %s824_s26 }
  0x12   : > { %v356_v6 = vmul.f32 %v347_v4, %v343_v2  ;;  %v358_v7 = vmul.f32 %v347_v4, %v342_v1  ;;  %v344_v9 = vld [vmem:[%s321_s16] sm:$0xff] }
  0x13   : > { %v345_v10 = vld [vmem:[%s325_s19] sm:$0xff]  ;;  %v353_v12 = vmul.f32 %v344_v9, %v343_v2  ;;  %v349_v16 = vmul.f32 %v344_v9, %v342_v1 }
  0x14   : > { %v352_v11 = vmul.f32 %v345_v10, %v342_v1  ;;  %v360_v13 = vsub.f32 %v358_v7, %v359_v8  ;;  %v357_v15 = vadd.f32 %v356_v6, %v355_v5  ;;  %v350_v17 = vmul.f32 %v345_v10, %v343_v2  ;;  %v348_v32 = vld [vmem:[%s337_s22] sm:$0xff] }
  0x15   : > { %744 = vmatpush3.msra.mxu1 %v348_v32 }
  0x16   : > { %v354_v14 = vsub.f32 %v352_v11, %v353_v12  ;;  %734 = vmatpush3.xpose.msk.msra.mxu0 %vm361_vm1, %v360_v13  ;;  %v351_v18 = vadd.f32 %v350_v17, %v349_v16 }
  0x17   : > { %738 = vmatprep.subr.mxu0 %v772_v0 }
  0x19   : > { %736 = vmatmul.mubr.msk.f32.vlgmr.msra.gmra.mrb[0].mxu0 %vm361_vm1, %v354_v14 }
  0x1a   : > { %739 = vmatpush3.xpose.msk.msra.mxu0 %vm361_vm1, %v357_v15  ;;  %740 = vmatprep.mubr.msk.f32.mxu0 %vm773_vm0, %v772_v0 }
  0x21   : > { %741 = vmatmul.mubr.msk.f32.vlgmr.msra.gmra.mrb[0].mxu0 %vm361_vm1, %v351_v18 }
  0xf4   : > { %v510_v22 = vpop.f32.mrb[0].mxu0 }
  0xf5   : > { %v514_v23 = vmul.f32 0.17677669, %v510_v22  ;;  %v742_v24 = vpop.f32.mrb[1].mxu0 }
  0xf7   : > { %v520_v25 = vsel %vm519_vm2, %v514_v23, -1e+30 }
  0xf8   : > { %v522_v26 = vsel %vm521_vm3, %v520_v25, -inf }
  0xf9   : > { %523 = vmax.xlane.f32.xlu0 %v522_v26 }
 0x186   : > { %v524_v27 = vpop.xlane.xlu0 %523 }
 0x187   : > { %v525_v28 = vsub.f32 %v520_v25, %v524_v27 }
 0x189   : > { %v526_v29 = vmul.f32 1.442695, %v525_v28 }
 0x18b   : > { %760 = vpow2.f32 %v526_v29 }
 0x195   : > { %v761_v30 = vpop.eup %760 }
 0x196   : > { %v528_v31 = vsel %vm521_vm3, %v761_v30, 0.0 }
 0x197   : > { %529 = vadd.xlane.f32.xlu0 %v528_v31 }
 0x224   : > { %v530_v33 = vpop.xlane.xlu0 %529 }
 0x225   : > { %762 = vrcp.f32 %v530_v33 }
 0x22f   : > { %v763_v34 = vpop.eup %762 }
 0x230   : > { %v532_v35 = vmul.f32 %v763_v34, %v761_v30 }
 0x232   : > { %746 = vmatmul.mubr.msk.f32.vlgmr.msra.gmra.mrb[0].mxu1 %vm521_vm3, %v532_v35 }
 0x305   : > { %v602_v36 = vpop.f32.mrb[0].mxu1 }
 0x306   : > { %607 = vst.msk [vmem:[%s341_s27] sm:$0xff] %vm606_vm4, %v602_v36  ;;  %v747_v37 = vpop.f32.mrb[1].mxu1 }
 0x307 PF: > { %s17_s24 = sadd.s32 1, %s770_s24  }
 0x308   : > { %p14_p4 = scmp.ge.s32.totalorder %s17_s24, 6  }
 0x30a   :  { %16 = sbr.rel (!%p14_p4) target bundleno = 1 (0x1), region = 90 }

// kernel: llama_forward.20
= control target key start
LH: loop header
LB: loop body
LE: loop exit
PB: predicated region body
PF: predicated region fallthrough
CT: control target
= control target key end

     0   :  { %vm31_vm0 = vcmask 523264   ;;  %vm113_vm1 = vcmask 261120   ;;  %s229_s1 = inlined_call_operand.vmem [shape: f32[64,32], index: 1, kind: input, shape index: {}]   ;;  %s230_s0 = inlined_call_operand.vmem [shape: f32[16,64], index: 0, kind: input, shape index: {}]   ;;  %s231_s2 = inlined_call_operand.vmem [shape: f32[1,32], index: 2, kind: input, shape index: {}]   ;;  %s232_s3 = inlined_call_operand.vmem [shape: f32[16,32], index: 3, kind: output, shape index: {}]  }
   0x1   :  { %v16_v0 = vld [vmem:[%s229_s1] sm:$0xff]  ;;  %v17_v1 = vld [vmem:[%s229_s1 + $0x8] sm:$0xff]  ;;  %v18_v2 = vld [vmem:[%s229_s1 + $0x10] sm:$0xff] }
   0x2   :  { %v152_v3 = vpack.c.bf16 %v17_v1, %v16_v0  ;;  %v19_v4 = vld [vmem:[%s229_s1 + $0x18] sm:$0xff]  ;;  %v20_v6 = vld [vmem:[%s229_s1 + $0x20] sm:$0xff]  ;;  %v21_v7 = vld [vmem:[%s229_s1 + $0x28] sm:$0xff] }
   0x3   :  { %v156_v5 = vpack.c.bf16 %v19_v4, %v18_v2  ;;  %v14_v8 = vld [vmem:[%s230_s0] sm:$0xff]  ;;  %v160_v9 = vpack.c.bf16 %v21_v7, %v20_v6  ;;  %v22_v10 = vld [vmem:[%s229_s1 + $0x30] sm:$0xff]  ;;  %v23_v11 = vld [vmem:[%s229_s1 + $0x38] sm:$0xff] }
   0x4   :  { %153 = vmatprep.subr.bf16.mxu0 %v152_v3  ;;  %149 = vmatprep.mubr.msk.f32.mxu0 %vm31_vm0, %v14_v8  ;;  %v164_v12 = vpack.c.bf16 %v23_v11, %v22_v10  ;;  %v15_v13 = vld [vmem:[%s230_s0 + $0x8] sm:$0xff]  ;;  %v120_v14 = vld [vmem:[%s231_s2] ss:$0 sm:$0xff] }
   0x5   :  { %155 = vmatpush3.bf16.msra.mxu0 %v152_v3 }
   0x6   :  { %157 = vmatprep.subr.bf16.mxu0 %v156_v5 }
   0x9   :  { %159 = vmatpush3.bf16.msra.mxu0 %v156_v5 }
   0xa   :  { %161 = vmatprep.subr.bf16.mxu0 %v160_v9 }
   0xd   :  { %163 = vmatpush3.bf16.msra.mxu0 %v160_v9 }
   0xe   :  { %165 = vmatprep.subr.bf16.mxu0 %v164_v12 }
  0x11   :  { %167 = vmatpush3.bf16.msra.mxu0 %v164_v12 }
  0x14   :  { %150 = vmatmul.mubr.msk.f32.vlgmr.msra.gmra.mrb[0].mxu0 %vm31_vm0, %v15_v13 }
  0xe7   :  { %v151_v15 = vpop.f32.mrb[0].mxu0 }
  0xe8   :  { %v110_v16 = vadd.f32 %v151_v15, %v120_v14  ;;  %v104_v17 = vpop.f32.mrb[1].mxu0 }
  0xe9   :  { %v105_v18 = vadd.f32 %v120_v14, %v104_v17 }
  0xea   :  { %115 = vst.msk [vmem:[%s232_s3 + $0x8] sm:$0xff] %vm113_vm1, %v110_v16 }
  0xeb   :  { %114 = vst.msk [vmem:[%s232_s3] sm:$0xff] %vm113_vm1, %v105_v18 }

// kernel: llama_forward.22
= control target key start
LH: loop header
LB: loop body
LE: loop exit
PB: predicated region body
PF: predicated region fallthrough
CT: control target
= control target key end

     0   :  { %vm27_vm0 = vcmask 261120   ;;  %s194_s1 = inlined_call_operand.vmem [shape: f32[32,32], index: 1, kind: input, shape index: {}]   ;;  %s195_s0 = inlined_call_operand.vmem [shape: f32[16,32], index: 0, kind: input, shape index: {}]   ;;  %s196_s2 = inlined_call_operand.vmem [shape: f32[1,32], index: 2, kind: input, shape index: {}]   ;;  %s197_s3 = inlined_call_operand.vmem [shape: f32[16,32], index: 3, kind: output, shape index: {}]  }
   0x1   :  { %v16_v0 = vld [vmem:[%s194_s1] sm:$0xff]  ;;  %v17_v1 = vld [vmem:[%s194_s1 + $0x8] sm:$0xff]  ;;  %v18_v2 = vld [vmem:[%s194_s1 + $0x10] sm:$0xff] }
   0x2   :  { %v135_v3 = vpack.c.bf16 %v17_v1, %v16_v0  ;;  %v19_v4 = vld [vmem:[%s194_s1 + $0x18] sm:$0xff]  ;;  %v14_v5 = vld [vmem:[%s195_s0] sm:$0xff]  ;;  %v15_v7 = vld [vmem:[%s195_s0 + $0x8] sm:$0xff] }
   0x3   :  { %v139_v6 = vpack.c.bf16 %v19_v4, %v18_v2  ;;  %132 = vmatprep.mubr.msk.f32.mxu0 %vm27_vm0, %v14_v5  ;;  %v115_v8 = vld [vmem:[%s196_s2] ss:$0 sm:$0xff] }
   0x4   :  { %136 = vmatprep.subr.bf16.mxu0 %v135_v3 }
   0x5   :  { %138 = vmatpush3.bf16.msra.mxu0 %v135_v3 }
   0x6   :  { %140 = vmatprep.subr.bf16.mxu0 %v139_v6 }
   0x9   :  { %142 = vmatpush3.bf16.msra.mxu0 %v139_v6 }
   0xc   :  { %133 = vmatmul.mubr.msk.f32.vlgmr.msra.gmra.mrb[0].mxu0 %vm27_vm0, %v15_v7 }
  0xdf   :  { %v134_v9 = vpop.f32.mrb[0].mxu0 }
  0xe0   :  { %v106_v10 = vadd.f32 %v134_v9, %v115_v8  ;;  %v100_v11 = vpop.f32.mrb[1].mxu0 }
  0xe1   :  { %v101_v12 = vadd.f32 %v115_v8, %v100_v11 }
  0xe2   :  { %110 = vst.msk [vmem:[%s197_s3 + $0x8] sm:$0xff] %vm27_vm0, %v106_v10 }
  0xe3   :  { %109 = vst.msk [vmem:[%s197_s3] sm:$0xff] %vm27_vm0, %v101_v12 }

// kernel: llama_forward.23
= control target key start
LH: loop header
LB: loop body
LE: loop exit
PB: predicated region body
PF: predicated region fallthrough
CT: control target
= control target key end

     0   :  { %vm37_vm0 = vcmask 261120   ;;  %s383_s1 = inlined_call_operand.vmem [shape: f32[32,32], index: 1, kind: input, shape index: {}]   ;;  %s384_s0 = inlined_call_operand.vmem [shape: f32[16,32], index: 0, kind: input, shape index: {}]   ;;  %s385_s3 = inlined_call_operand.vmem [shape: f32[32,32], index: 3, kind: input, shape index: {}]   ;;  %s386_s2 = inlined_call_operand.vmem [shape: f32[1,32], index: 2, kind: input, shape index: {}]   ;;  %s387_s5 = inlined_call_operand.<no memory space> [shape: f32[1], index: 5, kind: input, shape index: {}]   ;;  %s388_s4 = inlined_call_operand.vmem [shape: f32[1,32], index: 4, kind: input, shape index: {}]   ;;  %s389_s6 = inlined_call_operand.vmem [shape: f32[16,32], index: 6, kind: output, shape index: {}]  }
   0x1   :  { %v26_v0 = vld [vmem:[%s383_s1] sm:$0xff]  ;;  %v27_v1 = vld [vmem:[%s383_s1 + $0x8] sm:$0xff]  ;;  %v28_v2 = vld [vmem:[%s383_s1 + $0x10] sm:$0xff]  ;;  %v206_v16 = vstv %s387_s5 }
   0x2   :  { %v273_v3 = vpack.c.bf16 %v27_v1, %v26_v0  ;;  %v29_v4 = vld [vmem:[%s383_s1 + $0x18] sm:$0xff]  ;;  %v24_v5 = vld [vmem:[%s384_s0] sm:$0xff]  ;;  %v120_v8 = vld [vmem:[%s385_s3 + $0x8] sm:$0xff] }
   0x3   :  { %v277_v6 = vpack.c.bf16 %v29_v4, %v28_v2  ;;  %259 = vmatprep.mubr.msk.f32.mxu0 %vm37_vm0, %v24_v5  ;;  %v119_v7 = vld [vmem:[%s385_s3] sm:$0xff]  ;;  %v121_v9 = vld [vmem:[%s385_s3 + $0x10] sm:$0xff]  ;;  %270 = vmatprep.mubr.msk.f32.mxu1 %vm37_vm0, %v24_v5  ;;  %v122_v11 = vld [vmem:[%s385_s3 + $0x18] sm:$0xff] }
   0x4   :  { %274 = vmatprep.subr.bf16.mxu0 %v273_v3  ;;  %v281_v10 = vpack.c.bf16 %v120_v8, %v119_v7  ;;  %v285_v12 = vpack.c.bf16 %v122_v11, %v121_v9  ;;  %v25_v13 = vld [vmem:[%s384_s0 + $0x8] sm:$0xff]  ;;  %v231_v14 = vld [vmem:[%s386_s2] ss:$0 sm:$0xff] }
   0x5   :  { %276 = vmatpush3.bf16.msra.mxu0 %v273_v3  ;;  %v234_v30 = vld [vmem:[%s388_s4] ss:$0 sm:$0xff] }
   0x6   :  { %278 = vmatprep.subr.bf16.mxu0 %v277_v6  ;;  %282 = vmatprep.subr.bf16.mxu1 %v281_v10 }
   0x7   :  { %284 = vmatpush3.bf16.msra.mxu1 %v281_v10 }
   0x8   :  { %286 = vmatprep.subr.bf16.mxu1 %v285_v12 }
   0x9   :  { %280 = vmatpush3.bf16.msra.mxu0 %v277_v6 }
   0xb   :  { %288 = vmatpush3.bf16.msra.mxu1 %v285_v12 }
   0xc   :  { %260 = vmatmul.mubr.msk.f32.vlgmr.msra.gmra.mrb[0].mxu0 %vm37_vm0, %v25_v13 }
   0xe   :  { %271 = vmatmul.mubr.msk.f32.vlgmr.msra.gmra.mrb[0].mxu1 %vm37_vm0, %v25_v13 }
  0xdf   :  { %v261_v15 = vpop.f32.mrb[0].mxu0 }
  0xe0   :  { %v116_v17 = vadd.f32 %v261_v15, %v231_v14  ;;  %v110_v18 = vpop.f32.mrb[1].mxu0 }
  0xe1   :  { %v111_v19 = vadd.f32 %v231_v14, %v110_v18  ;;  %v272_v20 = vpop.f32.mrb[0].mxu1 }
  0xe2   :  { %v208_v21 = vmul.f32 %v206_v16, %v116_v17  ;;  %v196_v22 = vpop.f32.mrb[1].mxu1  ;;  %v202_v31 = vadd.f32 %v272_v20, %v234_v30 }
  0xe3   :  { %v207_v23 = vmul.f32 %v206_v16, %v111_v19  ;;  %v197_v33 = vadd.f32 %v234_v30, %v196_v22 }
  0xe4   :  { %v238_v24 = vmul.f32 -1.442695, %v208_v21 }
  0xe5   :  { %v237_v25 = vmul.f32 -1.442695, %v207_v23 }
  0xe6   :  { %289 = vpow2.f32 %v238_v24 }
  0xe7   :  { %291 = vpow2.f32 %v237_v25 }
  0xf0   :  { %v290_v26 = vpop.eup %289 }
  0xf1   :  { %v292_v27 = vpop.eup %291  ;;  %v216_v28 = vadd.f32 1.0, %v290_v26 }
  0xf2   :  { %v215_v29 = vadd.f32 1.0, %v292_v27 }
  0xf3   :  { %293 = vrcp.f32 %v216_v28 }
  0xf4   :  { %295 = vrcp.f32 %v215_v29 }
  0xfd   :  { %v294_v32 = vpop.eup %293 }
  0xfe   :  { %v296_v34 = vpop.eup %295  ;;  %v222_v35 = vmul.f32 %v294_v32, %v116_v17 }
  0xff   :  { %v221_v36 = vmul.f32 %v296_v34, %v111_v19 }
 0x100   :  { %v224_v37 = vmul.f32 %v222_v35, %v202_v31 }
 0x101   :  { %v223_v38 = vmul.f32 %v221_v36, %v197_v33 }
 0x102   :  { %226 = vst.msk [vmem:[%s389_s6 + $0x8] sm:$0xff] %vm37_vm0, %v224_v37 }
 0x103   :  { %225 = vst.msk [vmem:[%s389_s6] sm:$0xff] %vm37_vm0, %v223_v38 }

// kernel: llama_forward.33
= control target key start
LH: loop header
LB: loop body
LE: loop exit
PB: predicated region body
PF: predicated region fallthrough
CT: control target
= control target key end

     0   :  { %vm28_vm0 = vcmask 261120   ;;  %s240_s0 = inlined_call_operand.vmem [shape: f32[16,32], index: 0, kind: input, shape index: {}]   ;;  %s241_s1 = inlined_call_operand.vmem [shape: f32[32,64], index: 1, kind: input, shape index: {}]   ;;  %s242_s2 = inlined_call_operand.vmem [shape: f32[1,64], index: 2, kind: input, shape index: {}]   ;;  %s243_s3 = inlined_call_operand.hbm [shape: f32[16,64], index: 3, kind: output, shape index: {}]  }
   0x1   :  { %v17_v0 = vld [vmem:[%s241_s1] sm:$0xff]  ;;  %v18_v1 = vld [vmem:[%s241_s1 + $0x8] sm:$0xff]  ;;  %v19_v2 = vld [vmem:[%s241_s1 + $0x10] sm:$0xff] }
   0x2   :  { %v149_v3 = vpack.c.bf16 %v18_v1, %v17_v0  ;;  %v20_v4 = vld [vmem:[%s241_s1 + $0x18] sm:$0xff]  ;;  %v15_v5 = vld [vmem:[%s240_s0] sm:$0xff] }
   0x3   :  { %v153_v6 = vpack.c.bf16 %v20_v4, %v19_v2  ;;  %146 = vmatprep.mubr.msk.f32.mxu0 %vm28_vm0, %v15_v5 }
   0x4   :  { %8 = vsyncpa [#allocation3], 0  ;;  %150 = vmatprep.subr.bf16.mxu0 %v149_v3  ;;  %v16_v7 = vld [vmem:[%s240_s0 + $0x8] sm:$0xff]  ;;  %v129_v8 = vld [vmem:[%s242_s2] ss:$0 sm:$0xff]  ;;  %s184_s1 = smov [#allocation2]  }
   0x5   :  { %152 = vmatpush3.bf16.msra.mxu0 %v149_v3  ;;  %s118_s26 = sshll.u32 %s184_s1, 4  ;;  %vm110_vm1 = vcmask 523264   ;;  %s119_s26 = int_to_ptr.vmem [resolvable:$true] %s118_s26 }
   0x6   :  { %154 = vmatprep.subr.bf16.mxu0 %v153_v6  ;;  %s160_s27 = scalar_lea.vmem %s119_s26, 256  ;;  %p165_p1 = scmp.lt.s32.totalorder %s119_s26, %s119_s26 }
   0x7   :  { %p161_p0 = scmp.ne.s32.totalorder %s119_s26, %s160_s27  ;;  %p166_p2 = scmp.lt.s32.totalorder %s160_s27, %s160_s27 }
   0x9   :  { %156 = vmatpush3.bf16.msra.mxu0 %v153_v6  ;;  %p167_p3 = por %p166_p2, %p165_p1 }
   0xb   :  { %p168_p4 = pnand %p167_p3, %p161_p0 }
   0xc   :  { %147 = vmatmul.mubr.msk.f32.vlgmr.msra.gmra.mrb[0].mxu0 %vm28_vm0, %v16_v7 }
  0xdf   :  { %v148_v9 = vpop.f32.mrb[0].mxu0 }
  0xe0   :  { %v107_v10 = vadd.f32 %v148_v9, %v129_v8  ;;  %v101_v11 = vpop.f32.mrb[1].mxu0 }
  0xe1   :  { %v102_v12 = vadd.f32 %v129_v8, %v101_v11 }
  0xe2   :  { %112 = vst.msk [vmem:[#allocation2 + $0x8] sm:$0xff] %vm110_vm1, %v107_v10 }
  0xe3   :  { %111 = vst.msk [vmem:[#allocation2] sm:$0xff] %vm110_vm1, %v102_v12 }
  0xe4   :  { %171 = shalt.err (!%p168_p4)
}
  0xe5   :  { %s172_s2 = scalar_lea.hbm %s243_s3, 256 }
  0xe6   :  { %p173_p5 = scmp.ne.s32.totalorder %s243_s3, %s172_s2  ;;  %p176_p6 = scmp.lt.u32.totalorder %s172_s2, %s243_s3 }
  0xe8   :  { %p178_p7 = pnand %p176_p6, %p173_p5 }
  0xea   :  { %181 = shalt.err (!%p178_p7)
}
  0xeb   :  { %s185_s6 = smov 128   ;;  %s186_s7 = smov 8  }
  0xec   :  { %124 = dma.vmem_to_hbm [thread:$0]  %s119_s26, 256, %s243_s3, [#allocation3], %s185_s6, %s185_s6, %s186_s7  }
  0xed   :  { %182 = dma.done.wait [#allocation3], 256  }
  0xee   :  { %183 = vsyncadd [#allocation3], 4294967040 }
  0xef   :  { %128 = vsyncpa [#allocation3], 1 }

</bundles_post_ra>
